<compile_context>
chip_gen: v6e
topology: v6e:2x2x1
jax: 0.10.0
libtpu: 0.0.40
codegen_flags: <defaults>
</compile_context>

<pallas_src>
import functools

import jax
import jax.numpy as jnp
from jax.experimental import pallas as pl
from jax.experimental.pallas import tpu as pltpu


# ---------------------------------------------------------------------------
# Pallas kernel: fused base MLP + (fused, lane-dense) regression head.
# ---------------------------------------------------------------------------
def _mano_kernel(inp_ref, w1_ref, b1_ref, wh_ref, bh_ref, out_ref):
    # base_layer: Linear + ReLU (f32 accumulate on the MXU).
    feat = jnp.dot(inp_ref[...], w1_ref[...],
                   preferred_element_type=jnp.float32)
    feat = jnp.maximum(feat + b1_ref[...], 0.0)
    # fused pose|shape head (single MXU push; 128-wide lane-dense output).
    head = jnp.dot(feat.astype(wh_ref.dtype), wh_ref[...],
                   preferred_element_type=jnp.float32)
    out_ref[...] = (head + bh_ref[...]).astype(out_ref.dtype)


# ---------------------------------------------------------------------------
# Wrapper
# ---------------------------------------------------------------------------
def _round_up(x, m):
    return (x + m - 1) // m * m


def mano_branch_forward(inp, params, *, use_shape=False, mano_pose_coeff=1,
                        compute_dtype=jnp.bfloat16, block_b=512):
    """Pallas implementation of ManoBranch.forward (pose/shape predicted).

    inp: (B, D_in) float32
    params: dict with w1 (D_in,H), b1 (1,H), w2 (H,P), b2 (1,P),
            and (if use_shape) w3 (H,10), b3 (1,10).  Linear weights stored
            transposed vs. PyTorch: (in_features, out_features).
    Returns (pose, shape_or_None), matching the PyTorch module.
    """
    B, D_in = inp.shape
    H = params["w1"].shape[1]
    P = params["w2"].shape[1]

    # --- build fused head: [pose | shape] with coeff folded in, padded to 128
    wh = params["w2"]
    bh = params["b2"]
    n_head = P
    if use_shape:
        wh = jnp.concatenate([wh, params["w3"]], axis=1)
        bh = jnp.concatenate([bh, params["b3"]], axis=1)
        n_head = P + params["w3"].shape[1]
    if mano_pose_coeff != 1:
        col = jnp.arange(n_head)
        scale = jnp.where((col >= 3) & (col < P),
                          jnp.float32(mano_pose_coeff), jnp.float32(1.0))
        wh = wh * scale
        bh = bh * scale
    HP = max(128, _round_up(n_head, 128))          # lane-dense output width
    wh = jnp.pad(wh, ((0, 0), (0, HP - n_head)))
    bh = jnp.pad(bh, ((0, 0), (0, HP - n_head)))

    # --- MXU operand dtype (f32 accumulate stays inside the kernel)
    inp_c = inp.astype(compute_dtype)
    w1_c = params["w1"].astype(compute_dtype)
    wh_c = wh.astype(compute_dtype)
    b1_f = params["b1"].astype(jnp.float32)
    bh_f = bh.astype(jnp.float32)

    # --- batch tiling: resident weights, pipelined activation tiles
    tb = min(block_b, _round_up(B, 8))             # multiple of 8 sublanes
    b_pad = _round_up(B, tb)
    if b_pad != B:
        inp_c = jnp.pad(inp_c, ((0, b_pad - B), (0, 0)))
    grid = (b_pad // tb,)

    out_dtype = inp.dtype
    bytes_per = {jnp.dtype(jnp.bfloat16): 2, jnp.dtype(jnp.float32): 4}
    cb = bytes_per.get(jnp.dtype(compute_dtype), 4)
    cost = pl.CostEstimate(
        flops=2 * b_pad * D_in * H + 2 * b_pad * H * HP,
        transcendentals=0,
        bytes_accessed=(b_pad * D_in * cb + D_in * H * cb + H * 4
                        + H * HP * cb + HP * 4
                        + b_pad * HP * jnp.dtype(out_dtype).itemsize),
    )

    out = pl.pallas_call(
        _mano_kernel,
        out_shape=jax.ShapeDtypeStruct((b_pad, HP), out_dtype),
        grid=grid,
        in_specs=[
            pl.BlockSpec((tb, D_in), lambda i: (i, 0)),   # activations: tiled
            pl.BlockSpec((D_in, H), lambda i: (0, 0)),    # w1: resident
            pl.BlockSpec((1, H), lambda i: (0, 0)),       # b1: resident
            pl.BlockSpec((H, HP), lambda i: (0, 0)),      # fused head W
            pl.BlockSpec((1, HP), lambda i: (0, 0)),      # fused head b
        ],
        out_specs=pl.BlockSpec((tb, HP), lambda i: (i, 0)),
        compiler_params=pltpu.CompilerParams(
            dimension_semantics=("parallel",)),
        cost_estimate=cost,
    )(inp_c, w1_c, b1_f, wh_c, bh_f)

    pose = out[:B, :P]
    shape = out[:B, P:n_head] if use_shape else None
    return pose, shape


# ---------------------------------------------------------------------------
# Pure-JAX reference (mirrors the PyTorch forward exactly, f32)
# ---------------------------------------------------------------------------
def mano_branch_ref(inp, params, *, use_shape=False, mano_pose_coeff=1):
    feat = jnp.maximum(inp @ params["w1"] + params["b1"], 0.0)
    pose = feat @ params["w2"] + params["b2"]
    if mano_pose_coeff != 1:
        pose = jnp.concatenate([pose[:, :3], mano_pose_coeff * pose[:, 3:]], 1)
    shape = feat @ params["w3"] + params["b3"] if use_shape else None
    return pose, shape


# ---------------------------------------------------------------------------
# Deterministic parameter init (PyTorch-Linear-style uniform bounds)
# ---------------------------------------------------------------------------
def init_params(key, d_in, hidden, ncomps, use_shape):
    mano_pose_size = ncomps + 3  # use_pca=True
    ks = jax.random.split(key, 6)

    def linear(kw, kb, fan_in, fan_out):
        bound = 1.0 / jnp.sqrt(fan_in)
        w = jax.random.uniform(kw, (fan_in, fan_out), jnp.float32, -bound, bound)
        b = jax.random.uniform(kb, (1, fan_out), jnp.float32, -bound, bound)
        return w, b

    w1, b1 = linear(ks[0], ks[1], d_in, hidden)
    w2, b2 = linear(ks[2], ks[3], hidden, mano_pose_size)
    params = {"w1": w1, "b1": b1, "w2": w2, "b2": b2}
    if use_shape:
        w3, b3 = linear(ks[4], ks[5], hidden, 10)
        params.update({"w3": w3, "b3": b3})
    return params


# ---------------------------------------------------------------------------
if __name__ == "__main__":
    key = jax.random.PRNGKey(0)
    k_inp, k_par, k_inp2 = jax.random.split(key, 3)

    # Small shapes consistent with the module: base_neurons=[32, 32], ncomps=6.
    B, D_IN, HIDDEN, NCOMPS = 8, 32, 32, 6

    inp = jax.random.normal(k_inp, (B, D_IN), jnp.float32)

    ok = True

    # Config 1: module defaults (use_shape=False, coeff=1), f32 MXU operands
    # -> bit-tight check against the f32 reference.
    params = init_params(k_par, D_IN, HIDDEN, NCOMPS, use_shape=False)
    pose, shape = mano_branch_forward(inp, params, use_shape=False,
                                      mano_pose_coeff=1,
                                      compute_dtype=jnp.float32)
    pose = jax.block_until_ready(pose)
    pose_ref, shape_ref = mano_branch_ref(inp, params, use_shape=False,
                                          mano_pose_coeff=1)
    ok &= bool(jnp.allclose(pose, pose_ref, atol=1e-5, rtol=1e-5))
    ok &= shape is None and shape_ref is None

    # Config 2: use_shape=True, coeff=2, bf16 MXU operands (perf path)
    # -> looser tolerance vs. the f32 reference.
    params2 = init_params(k_par, D_IN, HIDDEN, NCOMPS, use_shape=True)
    pose2, shape2 = mano_branch_forward(inp, params2, use_shape=True,
                                        mano_pose_coeff=2,
                                        compute_dtype=jnp.bfloat16)
    pose2 = jax.block_until_ready(pose2)
    shape2 = jax.block_until_ready(shape2)
    pose2_ref, shape2_ref = mano_branch_ref(inp, params2, use_shape=True,
                                            mano_pose_coeff=2)
    ok &= bool(jnp.allclose(pose2, pose2_ref, atol=3e-2, rtol=3e-2))
    ok &= bool(jnp.allclose(shape2, shape2_ref, atol=3e-2, rtol=3e-2))

    # Config 3: batch not a multiple of the tile -> exercises batch padding.
    B3 = 12
    inp3 = jax.random.normal(k_inp2, (B3, D_IN), jnp.float32)
    pose3, _ = mano_branch_forward(inp3, params, use_shape=False,
                                   mano_pose_coeff=1,
                                   compute_dtype=jnp.float32)
    pose3 = jax.block_until_ready(pose3)
    pose3_ref, _ = mano_branch_ref(inp3, params, use_shape=False,
                                   mano_pose_coeff=1)
    ok &= pose3.shape == (B3, NCOMPS + 3)
    ok &= bool(jnp.allclose(pose3, pose3_ref, atol=1e-5, rtol=1e-5))

    if ok:
        print("KERNEL_OK")
    else:
        print("KERNEL_MISMATCH")
</pallas_src>

<mosaic_0001>
module attributes {stable_mosaic.version = 11 : i64} {
  func.func @_mano_kernel(%arg0: i32, %arg1: memref<8x32xf32, #tpu.memory_space<vmem>>, %arg2: memref<32x32xf32, #tpu.memory_space<vmem>>, %arg3: memref<1x32xf32, #tpu.memory_space<vmem>>, %arg4: memref<32x128xf32, #tpu.memory_space<vmem>>, %arg5: memref<1x128xf32, #tpu.memory_space<vmem>>, %arg6: memref<8x128xf32, #tpu.memory_space<vmem>>) attributes {dimension_semantics = [#tpu.dimension_semantics<parallel>], iteration_bounds = array<i64: 1>, scalar_prefetch = 0 : i64, scratch_operands = 0 : i64, tpu.core_type = #tpu.core_type<tc>, window_params = [{transform_indices = @transform_0, window_bounds = array<i64: 8, 32>}, {pipeline_mode = #tpu.pipeline_mode<synchronous>, transform_indices = @transform_1, window_bounds = array<i64: 32, 32>}, {pipeline_mode = #tpu.pipeline_mode<synchronous>, transform_indices = @transform_2, window_bounds = array<i64: 1, 32>}, {pipeline_mode = #tpu.pipeline_mode<synchronous>, transform_indices = @transform_3, window_bounds = array<i64: 32, 128>}, {pipeline_mode = #tpu.pipeline_mode<synchronous>, transform_indices = @transform_4, window_bounds = array<i64: 1, 128>}, {transform_indices = @transform_5, window_bounds = array<i64: 8, 128>}]} {
    %c0 = arith.constant 0 : index
    %c0_0 = arith.constant 0 : index
    %0 = vector.load %arg1[%c0, %c0_0] : memref<8x32xf32, #tpu.memory_space<vmem>>, vector<8x32xf32>
    %c0_1 = arith.constant 0 : index
    %c0_2 = arith.constant 0 : index
    %1 = vector.load %arg2[%c0_1, %c0_2] : memref<32x32xf32, #tpu.memory_space<vmem>>, vector<32x32xf32>
    %cst = arith.constant dense<0.000000e+00> : vector<8x32xf32>
    %2 = tpu.matmul %0, %1, %cst {dimension_numbers = #tpu.dot_dimension_numbers<[1], [0], [0], [1], [0, 0, 1, 1], [], []>} : vector<8x32xf32>, vector<32x32xf32>, vector<8x32xf32> -> vector<8x32xf32>
    %c0_3 = arith.constant 0 : index
    %c0_4 = arith.constant 0 : index
    %3 = vector.load %arg3[%c0_3, %c0_4] : memref<1x32xf32, #tpu.memory_space<vmem>>, vector<1x32xf32>
    %4 = vector.broadcast %3 : vector<1x32xf32> to vector<8x32xf32>
    %5 = arith.addf %2, %4 : vector<8x32xf32>
    %cst_5 = arith.constant 0.000000e+00 : f32
    %6 = vector.broadcast %cst_5 : f32 to vector<8x32xf32>
    %7 = arith.maximumf %5, %6 : vector<8x32xf32>
    %c0_6 = arith.constant 0 : index
    %c0_7 = arith.constant 0 : index
    %8 = vector.load %arg4[%c0_6, %c0_7] : memref<32x128xf32, #tpu.memory_space<vmem>>, vector<32x128xf32>
    %cst_8 = arith.constant dense<0.000000e+00> : vector<8x128xf32>
    %9 = tpu.matmul %7, %8, %cst_8 {dimension_numbers = #tpu.dot_dimension_numbers<[1], [0], [0], [1], [0, 0, 1, 1], [], []>} : vector<8x32xf32>, vector<32x128xf32>, vector<8x128xf32> -> vector<8x128xf32>
    %c0_9 = arith.constant 0 : index
    %c0_10 = arith.constant 0 : index
    %10 = vector.load %arg5[%c0_9, %c0_10] : memref<1x128xf32, #tpu.memory_space<vmem>>, vector<1x128xf32>
    %11 = vector.broadcast %10 : vector<1x128xf32> to vector<8x128xf32>
    %12 = arith.addf %9, %11 : vector<8x128xf32>
    %c0_11 = arith.constant 0 : index
    %c0_12 = arith.constant 0 : index
    %13 = vector.load %arg6[%c0_11, %c0_12] : memref<8x128xf32, #tpu.memory_space<vmem>>, vector<8x128xf32>
    tpu.vector_store %arg6[%c0_11, %c0_12], %12 {strides = array<i32>} : memref<8x128xf32, #tpu.memory_space<vmem>>, vector<8x128xf32>,
    return
  }
  func.func @transform_0(%arg0: i32) -> (i32, i32) {
    %c0_i32 = arith.constant 0 : i32
    %c0_i32_0 = arith.constant 0 : i32
    return %arg0, %c0_i32 : i32, i32
  }
  func.func @transform_1(%arg0: i32) -> (i32, i32) {
    %c0_i32 = arith.constant 0 : i32
    %c0_i32_0 = arith.constant 0 : i32
    %c0_i32_1 = arith.constant 0 : i32
    return %c0_i32, %c0_i32_0 : i32, i32
  }
  func.func @transform_2(%arg0: i32) -> (i32, i32) {
    %c0_i32 = arith.constant 0 : i32
    %c0_i32_0 = arith.constant 0 : i32
    %c0_i32_1 = arith.constant 0 : i32
    return %c0_i32, %c0_i32_0 : i32, i32
  }
  func.func @transform_3(%arg0: i32) -> (i32, i32) {
    %c0_i32 = arith.constant 0 : i32
    %c0_i32_0 = arith.constant 0 : i32
    %c0_i32_1 = arith.constant 0 : i32
    return %c0_i32, %c0_i32_0 : i32, i32
  }
  func.func @transform_4(%arg0: i32) -> (i32, i32) {
    %c0_i32 = arith.constant 0 : i32
    %c0_i32_0 = arith.constant 0 : i32
    %c0_i32_1 = arith.constant 0 : i32
    return %c0_i32, %c0_i32_0 : i32, i32
  }
  func.func @transform_5(%arg0: i32) -> (i32, i32) {
    %c0_i32 = arith.constant 0 : i32
    %c0_i32_0 = arith.constant 0 : i32
    return %arg0, %c0_i32 : i32, i32
  }
}

</mosaic_0001>

<bundles_post_ra>
// kernel: tpu_custom_call.1
= control target key start
LH: loop header
LB: loop body
LE: loop exit
PB: predicated region body
PF: predicated region fallthrough
CT: control target
= control target key end

     0   :  { %10 = vsyncpa [#allocation3], 0  ;;  %s436_s0 = inlined_call_operand.hbm [shape: f32[8,32], index: 0, kind: input, shape index: {}]   ;;  %s437_s1 = inlined_call_operand.hbm [shape: f32[32,32], index: 1, kind: input, shape index: {}]   ;;  %s438_s2 = inlined_call_operand.vmem [shape: f32[1,32], index: 2, kind: input, shape index: {}]   ;;  %s439_s3 = inlined_call_operand.hbm [shape: f32[32,128], index: 3, kind: input, shape index: {}]   ;;  %s440_s4 = inlined_call_operand.vmem [shape: f32[1,128], index: 4, kind: input, shape index: {}]   ;;  %s441_s5 = inlined_call_operand.hbm [shape: f32[8,128], index: 5, kind: output, shape index: {}]  }
   0x1   :  { %11 = vsyncpa [#allocation6], 0 }
   0x2   :  { %12 = vsyncpa [#allocation4], 0  ;;  %s378_s18 = smov [#allocation5]  }
   0x3   :  { %s28_s19 = sshll.u32 %s378_s18, 4  ;;  %s29_s19 = int_to_ptr.vmem [resolvable:$true] %s28_s19 }
   0x4   :  { %s300_s20 = scalar_lea.vmem %s29_s19, 512  ;;  %p305_p1 = scmp.lt.s32.totalorder %s29_s19, %s29_s19 }
   0x5   :  { %p301_p0 = scmp.ne.s32.totalorder %s29_s19, %s300_s20  ;;  %p306_p2 = scmp.lt.s32.totalorder %s300_s20, %s300_s20 }
   0x7   :  { %p307_p3 = por %p306_p2, %p305_p1 }
   0x9   :  { %p308_p4 = pnand %p307_p3, %p301_p0 }
   0xb   :  { %311 = shalt.err (!%p308_p4)
}
   0xc   :  { %s379_s21 = smov 128   ;;  %s380_s22 = smov 8  }
   0xd   :  { %34 = dma.hbm_to_vmem [thread:$0]  %s437_s1, 512, %s29_s19, [#allocation6], %s379_s21, %s379_s21, %s380_s22  }
   0xe   :  { %s381_s25 = smov [#allocation2]   ;;  %s382_s27 = smov [#allocation7]  }
   0xf   :  { %s19_s26 = sshll.u32 %s381_s25, 4  ;;  %s42_s28 = sshll.u32 %s382_s27, 4  ;;  %s20_s26 = int_to_ptr.vmem [resolvable:$true] %s19_s26  ;;  %s43_s28 = int_to_ptr.vmem [resolvable:$true] %s42_s28 }
  0x10   :  { %s320_s29 = scalar_lea.vmem %s20_s26, 128  ;;  %p325_p6 = scmp.lt.s32.totalorder %s20_s26, %s20_s26 }
  0x11   :  { %p321_p5 = scmp.ne.s32.totalorder %s20_s26, %s320_s29  ;;  %p326_p7 = scmp.lt.s32.totalorder %s320_s29, %s320_s29 }
  0x13   :  { %p327_p8 = por %p326_p7, %p325_p6 }
  0x15   :  { %p328_p9 = pnand %p327_p8, %p321_p5 }
  0x17   :  { %331 = shalt.err (!%p328_p9)
}
  0x18   :  { %22 = dma.hbm_to_vmem [thread:$0]  %s436_s0, 128, %s20_s26, [#allocation3]  }
  0x19   :  { %s340_s7 = scalar_lea.vmem %s43_s28, 512  ;;  %p345_p11 = scmp.lt.s32.totalorder %s43_s28, %s43_s28 }
  0x1a   :  { %p341_p10 = scmp.ne.s32.totalorder %s43_s28, %s340_s7  ;;  %p346_p12 = scmp.lt.s32.totalorder %s340_s7, %s340_s7 }
  0x1c   :  { %p347_p13 = por %p346_p12, %p345_p11 }
  0x1e   :  { %p348_p0 = pnand %p347_p13, %p341_p10 }
  0x20   :  { %351 = shalt.err (!%p348_p0)
}
  0x21   :  { %48 = dma.hbm_to_vmem [thread:$0]  %s439_s3, 512, %s43_s28, [#allocation6], %s379_s21, %s379_s21, %s380_s22  }
  0x22   :  { %372 = dma.done.wait [#allocation3], 128  }
  0x23   :  { %373 = vsyncadd [#allocation3], 4294967168 }
  0x24   :  { %374 = dma.done.wait [#allocation6], 1024  }
  0x25   :  { %375 = vsyncadd [#allocation6], 4294966272  ;;  %v383_v0 = vmov 0.0   ;;  %vm384_vm0 = vmmov 0   ;;  %v64_v1 = vld [vmem:[#allocation5 + $0x18] sm:$0xff]  ;;  %v63_v2 = vld [vmem:[#allocation5 + $0x10] sm:$0xff] }
  0x26   :  { %262 = vmatprep.subr.mxu0 %v383_v0  ;;  %270 = vmatprep.mubr.msk.f32.mxu0 %vm384_vm0, %v383_v0  ;;  %v150_v3 = vld [vmem:[#allocation7 + $0x18] sm:$0xff]  ;;  %v62_v4 = vld [vmem:[#allocation5 + $0x8] sm:$0xff]  ;;  %v61_v5 = vld [vmem:[#allocation5] sm:$0xff]  ;;  %vm72_vm1 = vcmask 261120   ;;  %s385_s11 = smov [#allocation8]  }
  0x27   :  { %273 = vmatprep.subr.mxu1 %v383_v0  ;;  %281 = vmatprep.mubr.msk.f32.mxu1 %vm384_vm0, %v383_v0  ;;  %v60_v6 = vld [vmem:[#allocation2] sm:$0xff]  ;;  %v149_v7 = vld [vmem:[#allocation7 + $0x10] sm:$0xff]  ;;  %v148_v8 = vld [vmem:[#allocation7 + $0x8] sm:$0xff]  ;;  %s238_s12 = sshll.u32 %s385_s11, 4  ;;  %s239_s12 = int_to_ptr.vmem [resolvable:$true] %s238_s12 }
  0x28   :  { %263 = vmatpush3.msra.mxu0 %v64_v1  ;;  %274 = vmatpush3.msra.mxu1 %v150_v3  ;;  %v147_v9 = vld [vmem:[#allocation7] sm:$0xff]  ;;  %v248_v10 = vld [vmem:[%s438_s2] ss:$0 sm:$0xff]  ;;  %s352_s13 = scalar_lea.vmem %s239_s12, 128  ;;  %p357_p2 = scmp.lt.s32.totalorder %s239_s12, %s239_s12 }
  0x29   :  { %264 = vmatprep.subr.mxu0 %v383_v0  ;;  %275 = vmatprep.subr.mxu1 %v383_v0  ;;  %v250_v15 = vld [vmem:[%s440_s4] ss:$0 sm:$0xff]  ;;  %p353_p1 = scmp.ne.s32.totalorder %s239_s12, %s352_s13  ;;  %p358_p3 = scmp.lt.s32.totalorder %s352_s13, %s352_s13 }
  0x2a   :  { %265 = vmatpush3.msra.mxu0 %v63_v2  ;;  %276 = vmatpush3.msra.mxu1 %v149_v7 }
  0x2b   :  { %266 = vmatprep.subr.mxu0 %v383_v0  ;;  %277 = vmatprep.subr.mxu1 %v383_v0  ;;  %p359_p4 = por %p358_p3, %p357_p2 }
  0x2c   :  { %267 = vmatpush3.msra.mxu0 %v62_v4  ;;  %278 = vmatpush3.msra.mxu1 %v148_v8 }
  0x2d   :  { %268 = vmatprep.subr.mxu0 %v383_v0  ;;  %279 = vmatprep.subr.mxu1 %v383_v0  ;;  %p360_p5 = pnand %p359_p4, %p353_p1 }
  0x2e   :  { %269 = vmatpush3.msra.mxu0 %v61_v5  ;;  %280 = vmatpush3.msra.mxu1 %v147_v9 }
  0x2f   :  { %271 = vmatmul.mubr.msk.f32.vlgmr.msra.gmra.mxu0 %vm72_vm1, %v60_v6 }
  0xef   :  { %v142_v11 = vpop.f32.mrf.mxu0 }
  0xf0   :  { %v143_v12 = vadd.f32 %v248_v10, %v142_v11 }
  0xf1   :  { %v272_v13 = vpop.f32.mrf.mxu0 }
  0xf2   :  { %v146_v14 = vmax.f32 %v143_v12, 0.0 }
  0xf4   :  { %282 = vmatmul.mubr.msk.f32.vlgmr.msra.gmra.mxu1 %vm72_vm1, %v146_v14 }
 0x1b4   :  { %v227_v16 = vpop.f32.mrf.mxu1 }
 0x1b5   :  { %v228_v17 = vadd.f32 %v250_v15, %v227_v16 }
 0x1b6   :  { %v283_v18 = vpop.f32.mrf.mxu1 }
 0x1b7   :  { %231 = vst [vmem:[#allocation8] sm:$0xff] %v228_v17 }
 0x1b8   :  { %363 = shalt.err (!%p360_p5)
}
 0x1b9   :  { %241 = dma.vmem_to_hbm [thread:$0]  %s239_s12, 128, %s441_s5, [#allocation4]  }
 0x1ba   :  { %376 = dma.done.wait [#allocation4], 128  }
 0x1bb   :  { %377 = vsyncadd [#allocation4], 4294967168 }
 0x1bc   :  { %245 = vsyncpa [#allocation3], 1 }
 0x1bd   :  { %246 = vsyncpa [#allocation6], 1 }
 0x1be   :  { %247 = vsyncpa [#allocation4], 1 }

</bundles_post_ra>
